<compile_context>
chip_gen: v5e
topology: v5e:2x2
jax: 0.10.0
libtpu: 0.0.40
codegen_flags: <defaults>
</compile_context>

<pallas_src>
import jax
import jax.numpy as jnp
from jax.experimental import pallas as pl
from jax.experimental.pallas import tpu as pltpu  # noqa: F401  (TPU backend)

EPS = 1e-5


def mlp_head_kernel(x_ref, w1_ref, gb_ref, w2_ref, b2_ref, o_ref):
    x = x_ref[...]                                                     # [B, D_in]

    # ---- Linear 1 (MXU). Bias b1 intentionally omitted: cancelled by BN mean. ----
    h = jnp.dot(x, w1_ref[...], preferred_element_type=jnp.float32)   # [B, H]

    # ---- BatchNorm1d (training-mode batch stats), single-pass, fused affine ----
    inv_b = 1.0 / h.shape[0]
    mean = jnp.sum(h, axis=0, keepdims=True) * inv_b                   # [1, H]
    mean_sq = jnp.sum(h * h, axis=0, keepdims=True) * inv_b            # [1, H]
    var = jnp.maximum(mean_sq - mean * mean, 0.0)                      # biased var
    gamma = gb_ref[0:1, :]                                             # [1, H]
    beta = gb_ref[1:2, :]                                              # [1, H]
    scale = gamma * jax.lax.rsqrt(var + EPS)                           # [1, H]
    shift = beta - mean * scale                                        # [1, H]

    # One fused scale/shift + ReLU on the [B, H] tile.
    h = jnp.maximum(h * scale + shift, 0.0)

    # ---- Linear 2 (MXU) ----
    out = jnp.dot(h, w2_ref[...], preferred_element_type=jnp.float32)  # [B, E_pad]
    out = out + b2_ref[...]

    o_ref[...] = out.astype(o_ref.dtype)


def mlp_head_forward(x, w1_t, b1, gamma, beta, w2_t, b2):
    """x: [B, input_dim]; w1_t: [input_dim, hidden]; w2_t: [hidden, embedding_dim]."""
    del b1  # mathematically cancelled by training-mode BatchNorm mean subtraction
    B, D_in = x.shape
    H = w1_t.shape[1]
    E = w2_t.shape[1]

    # Pack BN params into one slab -> single small DMA instead of several.
    gb = jnp.stack([gamma, beta], axis=0)                              # [2, H]

    # Lane-dense output: pad embedding dim up to a multiple of 128 so the output
    # store is an unmasked full-lane write; slice the padding off outside.
    E_pad = ((E + 127) // 128) * 128
    if E_pad != E:
        w2_p = jnp.pad(w2_t, ((0, 0), (0, E_pad - E)))
        b2_p = jnp.pad(b2, (0, E_pad - E)).reshape(1, E_pad)
    else:
        w2_p = w2_t
        b2_p = b2.reshape(1, E_pad)

    full = lambda shape: pl.BlockSpec(shape, lambda: tuple(0 for _ in shape))

    out_p = pl.pallas_call(
        mlp_head_kernel,
        out_shape=jax.ShapeDtypeStruct((B, E_pad), x.dtype),
        grid=(),
        in_specs=[
            full((B, D_in)),
            full((D_in, H)),
            full((2, H)),
            full((H, E_pad)),
            full((1, E_pad)),
        ],
        out_specs=full((B, E_pad)),
    )(x, w1_t, gb, w2_p, b2_p)

    # TODO(synk): if this head is tiled over B in production (inference-mode BN
    # with running stats), add grid=(B//TB,) with weights resident via constant
    # index_maps and dimension_semantics=("parallel",).
    return out_p[:, :E]


def init_params(key, input_dim, embedding_dim, hidden_size):
    """Deterministic synthetic init mirroring PyTorch Linear/BatchNorm shapes."""
    k1, k2, k3, k4 = jax.random.split(key, 4)
    # PyTorch Linear weight is [out, in]; we store the transpose [in, out].
    bound1 = 1.0 / (input_dim ** 0.5)
    w1_t = jax.random.uniform(k1, (input_dim, hidden_size), jnp.float32, -bound1, bound1)
    b1 = jax.random.uniform(k2, (hidden_size,), jnp.float32, -bound1, bound1)
    gamma = jnp.ones((hidden_size,), jnp.float32)   # BatchNorm1d weight
    beta = jnp.zeros((hidden_size,), jnp.float32)   # BatchNorm1d bias
    bound2 = 1.0 / (hidden_size ** 0.5)
    w2_t = jax.random.uniform(k3, (hidden_size, embedding_dim), jnp.float32, -bound2, bound2)
    b2 = jax.random.uniform(k4, (embedding_dim,), jnp.float32, -bound2, bound2)
    return w1_t, b1, gamma, beta, w2_t, b2


def reference_forward(x, w1_t, b1, gamma, beta, w2_t, b2):
    """Faithful PyTorch-semantics reference (includes b1 and two-pass variance)."""
    h = x @ w1_t + b1
    mean = h.mean(0, keepdims=True)
    var = ((h - mean) ** 2).mean(0, keepdims=True)
    h = (h - mean) / jnp.sqrt(var + EPS) * gamma + beta
    h = jnp.maximum(h, 0.0)
    return h @ w2_t + b2


if __name__ == "__main__":
    key = jax.random.PRNGKey(0)
    kx, kp = jax.random.split(key)

    B, INPUT_DIM, EMBEDDING_DIM, HIDDEN = 8, 32, 16, 64
    x = jax.random.normal(kx, (B, INPUT_DIM), jnp.float32)
    params = init_params(kp, INPUT_DIM, EMBEDDING_DIM, HIDDEN)

    out = mlp_head_forward(x, *params)
    out = jax.block_until_ready(out)

    ref = reference_forward(x, *params)
    assert out.shape == (B, EMBEDDING_DIM)
    assert jnp.allclose(out, ref, atol=1e-4, rtol=1e-4), "mismatch vs reference"

    print("KERNEL_OK")
</pallas_src>

<mosaic_0001>
module attributes {stable_mosaic.version = 11 : i64} {
  func.func @mlp_head_kernel(%arg0: memref<8x32xf32, #tpu.memory_space<vmem>>, %arg1: memref<32x64xf32, #tpu.memory_space<vmem>>, %arg2: memref<2x64xf32, #tpu.memory_space<vmem>>, %arg3: memref<64x128xf32, #tpu.memory_space<vmem>>, %arg4: memref<1x128xf32, #tpu.memory_space<vmem>>, %arg5: memref<8x128xf32, #tpu.memory_space<vmem>>) attributes {dimension_semantics = [], scalar_prefetch = 0 : i64, scratch_operands = 0 : i64, tpu.core_type = #tpu.core_type<tc>} {
    %c0 = arith.constant 0 : index
    %c0_0 = arith.constant 0 : index
    %0 = vector.load %arg0[%c0, %c0_0] : memref<8x32xf32, #tpu.memory_space<vmem>>, vector<8x32xf32>
    %c0_1 = arith.constant 0 : index
    %c0_2 = arith.constant 0 : index
    %1 = vector.load %arg1[%c0_1, %c0_2] : memref<32x64xf32, #tpu.memory_space<vmem>>, vector<32x64xf32>
    %cst = arith.constant dense<0.000000e+00> : vector<8x64xf32>
    %2 = tpu.matmul %0, %1, %cst {dimension_numbers = #tpu.dot_dimension_numbers<[1], [0], [0], [1], [0, 0, 1, 1], [], []>} : vector<8x32xf32>, vector<32x64xf32>, vector<8x64xf32> -> vector<8x64xf32>
    %cst_3 = arith.constant dense<0.000000e+00> : vector<64xf32>
    %3 = vector.multi_reduction <add>, %2, %cst_3 [0] : vector<8x64xf32> to vector<64xf32>
    %4 = vector.shape_cast %3 : vector<64xf32> to vector<1x64xf32>
    %cst_4 = arith.constant 1.250000e-01 : f32
    %5 = vector.broadcast %cst_4 : f32 to vector<1x64xf32>
    %6 = arith.mulf %4, %5 : vector<1x64xf32>
    %7 = arith.mulf %2, %2 : vector<8x64xf32>
    %cst_5 = arith.constant dense<0.000000e+00> : vector<64xf32>
    %8 = vector.multi_reduction <add>, %7, %cst_5 [0] : vector<8x64xf32> to vector<64xf32>
    %9 = vector.shape_cast %8 : vector<64xf32> to vector<1x64xf32>
    %cst_6 = arith.constant 1.250000e-01 : f32
    %10 = vector.broadcast %cst_6 : f32 to vector<1x64xf32>
    %11 = arith.mulf %9, %10 : vector<1x64xf32>
    %12 = arith.mulf %6, %6 : vector<1x64xf32>
    %13 = arith.subf %11, %12 : vector<1x64xf32>
    %cst_7 = arith.constant 0.000000e+00 : f32
    %14 = vector.broadcast %cst_7 : f32 to vector<1x64xf32>
    %15 = arith.maximumf %13, %14 : vector<1x64xf32>
    %c0_8 = arith.constant 0 : index
    %c0_9 = arith.constant 0 : index
    %16 = vector.load %arg2[%c0_8, %c0_9] : memref<2x64xf32, #tpu.memory_space<vmem>>, vector<1x64xf32>
    %c1 = arith.constant 1 : index
    %c0_10 = arith.constant 0 : index
    %17 = vector.load %arg2[%c1, %c0_10] : memref<2x64xf32, #tpu.memory_space<vmem>>, vector<1x64xf32>
    %cst_11 = arith.constant 9.99999974E-6 : f32
    %18 = vector.broadcast %cst_11 : f32 to vector<1x64xf32>
    %19 = arith.addf %15, %18 : vector<1x64xf32>
    %20 = math.rsqrt %19 : vector<1x64xf32>
    %21 = arith.mulf %16, %20 : vector<1x64xf32>
    %22 = arith.mulf %6, %21 : vector<1x64xf32>
    %23 = arith.subf %17, %22 : vector<1x64xf32>
    %24 = vector.broadcast %21 : vector<1x64xf32> to vector<8x64xf32>
    %25 = arith.mulf %2, %24 : vector<8x64xf32>
    %26 = vector.broadcast %23 : vector<1x64xf32> to vector<8x64xf32>
    %27 = arith.addf %25, %26 : vector<8x64xf32>
    %cst_12 = arith.constant 0.000000e+00 : f32
    %28 = vector.broadcast %cst_12 : f32 to vector<8x64xf32>
    %29 = arith.maximumf %27, %28 : vector<8x64xf32>
    %c0_13 = arith.constant 0 : index
    %c0_14 = arith.constant 0 : index
    %30 = vector.load %arg3[%c0_13, %c0_14] : memref<64x128xf32, #tpu.memory_space<vmem>>, vector<64x128xf32>
    %cst_15 = arith.constant dense<0.000000e+00> : vector<8x128xf32>
    %31 = tpu.matmul %29, %30, %cst_15 {dimension_numbers = #tpu.dot_dimension_numbers<[1], [0], [0], [1], [0, 0, 1, 1], [], []>} : vector<8x64xf32>, vector<64x128xf32>, vector<8x128xf32> -> vector<8x128xf32>
    %c0_16 = arith.constant 0 : index
    %c0_17 = arith.constant 0 : index
    %32 = vector.load %arg4[%c0_16, %c0_17] : memref<1x128xf32, #tpu.memory_space<vmem>>, vector<1x128xf32>
    %33 = vector.broadcast %32 : vector<1x128xf32> to vector<8x128xf32>
    %34 = arith.addf %31, %33 : vector<8x128xf32>
    %c0_18 = arith.constant 0 : index
    %c0_19 = arith.constant 0 : index
    %35 = vector.load %arg5[%c0_18, %c0_19] : memref<8x128xf32, #tpu.memory_space<vmem>>, vector<8x128xf32>
    tpu.vector_store %arg5[%c0_18, %c0_19], %34 {strides = array<i32>} : memref<8x128xf32, #tpu.memory_space<vmem>>, vector<8x128xf32>,
    return
  }
}

</mosaic_0001>

<bundles_post_ra>
// kernel: tpu_custom_call.1
= control target key start
LH: loop header
LB: loop body
LE: loop exit
PB: predicated region body
PF: predicated region fallthrough
CT: control target
= control target key end

     0   :  { %10 = vsyncpa [#allocation3], 0  ;;  %s404_s0 = inlined_call_operand.hbm [shape: f32[8,32], index: 0, kind: input, shape index: {}]   ;;  %s405_s1 = inlined_call_operand.hbm [shape: f32[32,64], index: 1, kind: input, shape index: {}]   ;;  %s406_s2 = inlined_call_operand.hbm [shape: f32[2,64], index: 2, kind: input, shape index: {}]   ;;  %s407_s3 = inlined_call_operand.hbm [shape: f32[64,128], index: 3, kind: input, shape index: {}]   ;;  %s408_s4 = inlined_call_operand.vmem [shape: f32[1,128], index: 4, kind: input, shape index: {}]   ;;  %s409_s5 = inlined_call_operand.hbm [shape: f32[8,128], index: 5, kind: output, shape index: {}]  }
   0x1   :  { %11 = vsyncpa [#allocation6], 0 }
   0x2   :  { %12 = vsyncpa [#allocation9], 0  ;;  %s29_s20 = sshll.u32 %s405_s1, 4  ;;  %s30_s20 = int_to_ptr.hbm [resolvable:$true] %s29_s20 }
   0x3   :  { %13 = vsyncpa [#allocation4], 0  ;;  %s346_s21 = smov [#allocation5]   ;;  %s19_s25 = sshll.u32 %s404_s0, 4  ;;  %s20_s25 = int_to_ptr.hbm [resolvable:$true] %s19_s25 }
   0x4   :  { %s31_s22 = sshll.u32 %s346_s21, 4  ;;  %s347_s26 = smov 128   ;;  %s32_s22 = int_to_ptr.vmem [resolvable:$true] %s31_s22 }
   0x5   :  { %s348_s27 = smov 8   ;;  %s349_s28 = smov [#allocation2]  }
   0x6   :  { %37 = dma.hbm_to_vmem [thread:$0]  %s30_s20, 512, %s32_s22, [#allocation6], %s347_s26, %s347_s26, %s348_s27  }
   0x7   :  { %s21_s29 = sshll.u32 %s349_s28, 4  ;;  %s43_s7 = sshll.u32 %s406_s2, 4  ;;  %s22_s29 = int_to_ptr.vmem [resolvable:$true] %s21_s29  ;;  %s44_s7 = int_to_ptr.hbm [resolvable:$true] %s43_s7 }
   0x8   :  { %24 = dma.hbm_to_vmem [thread:$0]  %s20_s25, 128, %s22_s29, [#allocation3]  }
   0x9   :  { %s53_s9 = sshll.u32 %s407_s3, 4  ;;  %s350_s10 = smov [#allocation7]   ;;  %s54_s9 = int_to_ptr.hbm [resolvable:$true] %s53_s9 }
   0xa   :  { %s45_s11 = sshll.u32 %s350_s10, 4  ;;  %s351_s0 = smov [#allocation8]   ;;  %s46_s11 = int_to_ptr.vmem [resolvable:$true] %s45_s11 }
   0xb   :  { %48 = dma.hbm_to_vmem [thread:$0]  %s44_s7, 32, %s46_s11, [#allocation6]  }
   0xc   :  { %s55_s12 = sshll.u32 %s351_s0, 4  ;;  %s56_s12 = int_to_ptr.vmem [resolvable:$true] %s55_s12 }
   0xd   :  { %61 = dma.hbm_to_vmem [thread:$0]  %s54_s9, 1024, %s56_s12, [#allocation9], %s347_s26, %s347_s26, %s348_s27  }
   0xe   :  { %338 = dma.done.wait [#allocation3], 128  }
   0xf   :  { %339 = vsyncadd [#allocation3], 4294967168 }
  0x10   :  { %340 = dma.done.wait [#allocation6], 544  }
  0x11   :  { %341 = vsyncadd [#allocation6], 4294966752 }
  0x12   :  { %342 = dma.done.wait [#allocation9], 1024  }
  0x13   :  { %343 = vsyncadd [#allocation9], 4294966272  ;;  %v84_v0 = vld [vmem:[#allocation5 + $0x18] sm:$0xff]  ;;  %v83_v1 = vld [vmem:[#allocation5 + $0x10] sm:$0xff]  ;;  %vm85_vm0 = vcmask 261120   ;;  %vm109_vm1 = vcmask 523264  }
  0x14   :  { %101 = vmatpush.msra.mxu0 %v84_v0  ;;  %v82_v2 = vld [vmem:[#allocation5 + $0x8] sm:$0xff]  ;;  %v81_v3 = vld [vmem:[#allocation5] sm:$0xff]  ;;  %v80_v4 = vld [vmem:[#allocation2] sm:$0xff]  ;;  %s352_s13 = smov [#allocation10]   ;;  %s194_s17 = sshll.u32 %s409_s5, 4  ;;  %s195_s17 = int_to_ptr.hbm [resolvable:$true] %s194_s17 }
  0x15   :  { %v158_v14 = vld [vmem:[#allocation8 + $0x38] sm:$0xff]  ;;  %v157_v17 = vld [vmem:[#allocation8 + $0x30] sm:$0xff]  ;;  %v156_v20 = vld [vmem:[#allocation8 + $0x28] sm:$0xff]  ;;  %s192_s14 = sshll.u32 %s352_s13, 4  ;;  %s193_s14 = int_to_ptr.vmem [resolvable:$true] %s192_s14 }
  0x16   :  { %102 = vmatpush.msra.mxu0 %v83_v1  ;;  %174 = vmatpush.msra.mxu1 %v158_v14  ;;  %v155_v23 = vld [vmem:[#allocation8 + $0x20] sm:$0xff]  ;;  %v154_v26 = vld [vmem:[#allocation8 + $0x18] sm:$0xff]  ;;  %v153_v29 = vld [vmem:[#allocation8 + $0x10] sm:$0xff] }
  0x17   :  { %v152_v31 = vld [vmem:[#allocation8 + $0x8] sm:$0xff]  ;;  %v151_v32 = vld [vmem:[#allocation8] sm:$0xff]  ;;  %v130_v40 = vld [vmem:[#allocation7] sm:$0x1] }
  0x18   :  { %103 = vmatpush.msra.mxu0 %v82_v2  ;;  %175 = vmatpush.msra.mxu1 %v157_v17  ;;  %v131_v44 = vld [vmem:[#allocation7 + $0x1] sm:$0x1]  ;;  %v215_v52 = vld [vmem:[%s408_s4] ss:$0 sm:$0xff] }
  0x1a   :  { %104 = vmatpush.msra.mxu0 %v81_v3  ;;  %176 = vmatpush.msra.mxu1 %v156_v20 }
  0x1b   :  { %206 = vmatmul.msk.f32.vlgmr.msra.gmra.mxu0 %vm85_vm0, %v80_v4 }
  0x1c   :  { %177 = vmatpush.msra.mxu1 %v155_v23 }
  0x1e   :  { %178 = vmatpush.msra.mxu1 %v154_v26 }
  0x20   :  { %179 = vmatpush.msra.mxu1 %v153_v29 }
  0x22   :  { %180 = vmatpush.msra.mxu1 %v152_v31 }
  0x24   :  { %181 = vmatpush.msra.mxu1 %v151_v32 }
  0x98   :  { %v106_v5 = vpop.f32.mrf.mxu0 }
  0x99   :  { %v110_v6 = vsel %vm109_vm1, %v106_v5, 0.0  ;;  %v118_v7 = vmul.f32 %v106_v5, %v106_v5 }
  0x9a   :  { %v111_v8 = vrot.slane %v110_v6, 4 }
  0x9b   :  { %v119_v9 = vsel %vm109_vm1, %v118_v7, 0.0 }
  0x9c   :  { %v112_v10 = vadd.f32 %v111_v8, %v110_v6  ;;  %v120_v11 = vrot.slane %v119_v9, 4 }
  0x9e   :  { %v113_v12 = vrot.slane %v112_v10, 2  ;;  %v121_v13 = vadd.f32 %v120_v11, %v119_v9 }
  0xa0   :  { %v114_v15 = vadd.f32 %v113_v12, %v112_v10  ;;  %v122_v16 = vrot.slane %v121_v13, 2 }
  0xa2   :  { %v115_v18 = vrot.slane %v114_v15, 1  ;;  %v123_v19 = vadd.f32 %v122_v16, %v121_v13 }
  0xa4   :  { %v116_v21 = vadd.f32 %v115_v18, %v114_v15  ;;  %v124_v22 = vrot.slane %v123_v19, 1 }
  0xa6   :  { %v117_v24 = vmul.f32 0.125, %v116_v21  ;;  %v125_v25 = vadd.f32 %v124_v22, %v123_v19 }
  0xa8   :  { %v126_v27 = vmul.f32 0.125, %v125_v25  ;;  %v127_v28 = vmul.f32 %v117_v24, %v117_v24 }
  0xaa   :  { %v128_v30 = vsub.f32 %v126_v27, %v127_v28 }
  0xac   :  { %v129_v33 = vmax.f32 %v128_v30, 0.0 }
  0xae   :  { %v132_v34 = vadd.f32 1e-05, %v129_v33 }
  0xb0   :  { %216 = vrsqrt.f32 %v132_v34  ;;  %vm139_vm3 = vweird.f32 %v132_v34 }
  0xb6   :  { %v217_v35 = vpop.eup %216 }
  0xb7   :  { %v134_v36 = vmul.f32 %v217_v35, %v132_v34  ;;  %vm140_vm2 = vweird.f32 %v217_v35 }
  0xb8   :  { %vm141_vm4 = vmor %vm139_vm3, %vm140_vm2 }
  0xb9   :  { %v135_v37 = vmul.f32 %v217_v35, %v134_v36 }
  0xbb   :  { %v136_v38 = vmul.f32 0.5, %v135_v37 }
  0xbd   :  { %v137_v39 = vsub.f32 1.5, %v136_v38 }
  0xbf   :  { %v138_v41 = vmul.f32 %v217_v35, %v137_v39 }
  0xc1   :  { %v142_v42 = vsel %vm141_vm4, %v217_v35, %v138_v41 }
  0xc2   :  { %v143_v43 = vmul.f32 %v142_v42, %v130_v40 }
  0xc4   :  { %v144_v45 = vmul.f32 %v143_v43, %v117_v24  ;;  %v146_v46 = vperm.slane %v143_v43, 0 }
  0xc6   :  { %v145_v47 = vsub.f32 %v131_v44, %v144_v45  ;;  %v147_v48 = vmul.f32 %v146_v46, %v106_v5 }
  0xc8   :  { %v148_v49 = vperm.slane %v145_v47, 0 }
  0xca   :  { %v149_v50 = vadd.f32 %v148_v49, %v147_v48 }
  0xcc   :  { %v150_v51 = vmax.f32 %v149_v50, 0.0 }
  0xce   :  { %207 = vmatmul.msk.f32.vlgmr.msra.gmra.mxu1 %vm109_vm1, %v150_v51 }
 0x14b   :  { %v183_v53 = vpop.f32.mrf.mxu1 }
 0x14c   :  { %v184_v54 = vadd.f32 %v215_v52, %v183_v53 }
 0x14e   :  { %186 = vst [vmem:[#allocation10] sm:$0xff] %v184_v54 }
 0x14f   :  { %197 = dma.vmem_to_hbm [thread:$0]  %s193_s14, 128, %s195_s17, [#allocation4]  }
 0x150   :  { %344 = dma.done.wait [#allocation4], 128  }
 0x151   :  { %345 = vsyncadd [#allocation4], 4294967168 }
 0x152   :  { %202 = vsyncpa [#allocation3], 1 }
 0x153   :  { %203 = vsyncpa [#allocation6], 1 }
 0x154   :  { %204 = vsyncpa [#allocation9], 1 }
 0x155   :  { %205 = vsyncpa [#allocation4], 1 }

</bundles_post_ra>
